<compile_context>
chip_gen: v7x
topology: tpu7x:2x2x1
jax: 0.10.0
libtpu: 0.0.40
codegen_flags: <defaults>
</compile_context>

<pallas_src>
import functools

import jax
import jax.numpy as jnp
from jax.experimental import pallas as pl
from jax.experimental.pallas import tpu as pltpu


def _round_up(n: int, m: int) -> int:
    return ((n + m - 1) // m) * m


# ----------------------------------------------------------------------------- kernel
def fcbody_kernel(x_ref, w1_ref, b1_ref, w2_ref, b2_ref, o_ref):
    """Fused 2-layer MLP on one batch tile: relu(relu(x@W1+b1)@W2+b2)."""
    # Cast the x tile to the (bf16) weight dtype for the MXU; accumulate in f32.
    x = x_ref[...].astype(w1_ref.dtype)
    h1 = jnp.dot(x, w1_ref[...], preferred_element_type=jnp.float32)
    h1 = jnp.maximum(h1 + b1_ref[...], 0.0)                       # bias/ReLU in f32
    h2 = jnp.dot(h1.astype(w2_ref.dtype), w2_ref[...],
                 preferred_element_type=jnp.float32)
    h2 = jnp.maximum(h2 + b2_ref[...], 0.0)
    o_ref[...] = h2.astype(o_ref.dtype)                           # unpadded store


# ------------------------------------------------------------------------ param prep
def prepare_fcbody_params(w1, b1, w2, b2, compute_dtype=jnp.bfloat16):
    """One-time packing (do at parameter load/update time, NOT per forward):
    - transpose PyTorch (out, in) weights to (in, out),
    - zero-pad ONLY the intermediate hidden dim to a multiple of 128 lanes,
    - cast weights to the MXU compute dtype (bf16 by default).
    The final feature dim is deliberately left unpadded so the kernel's output
    store is exactly (batch, feature_dim)."""
    state_dim = w1.shape[1]
    h1_dim, h2_dim = w1.shape[0], w2.shape[0]
    h1p = _round_up(h1_dim, 128)

    w1_t = jnp.zeros((state_dim, h1p), compute_dtype).at[:, :h1_dim].set(
        jnp.transpose(w1).astype(compute_dtype))
    b1_p = jnp.zeros((1, h1p), jnp.float32).at[:, :h1_dim].set(
        b1.astype(jnp.float32))
    w2_t = jnp.zeros((h1p, h2_dim), compute_dtype).at[:h1_dim, :].set(
        jnp.transpose(w2).astype(compute_dtype))
    b2_p = b2.astype(jnp.float32).reshape(1, h2_dim)
    return (w1_t, b1_p, w2_t, b2_p)


def _choose_batch_tile(batch: int, block_batch: int) -> int:
    """Batch tile: aim for >=2 grid steps (v7x megacore + pipeline overlap),
    capped at block_batch; multiple of 8 sublanes unless the whole batch fits
    in one step."""
    target = min(block_batch, max(8, _round_up((batch + 1) // 2, 8)))
    if target >= batch:
        return batch                      # single full-extent tile
    return (target // 8) * 8              # partial final tile handled by Pallas


# -------------------------------------------------------------------------- forward
@functools.partial(jax.jit, static_argnames=("block_batch", "out_dtype"))
def fcbody_forward(x, params, *, block_batch=4096, out_dtype=jnp.bfloat16):
    """y = relu(relu(x @ W1.T + b1) @ W2.T + b2), batch-tiled Pallas kernel."""
    w1_t, b1_p, w2_t, b2_p = params
    batch, state_dim = x.shape
    h1p = w1_t.shape[1]
    feat = w2_t.shape[1]                  # unpadded feature_dim (static shape)

    tb = _choose_batch_tile(batch, block_batch)
    grid = (pl.cdiv(batch, tb),)

    return pl.pallas_call(
        fcbody_kernel,
        out_shape=jax.ShapeDtypeStruct((batch, feat), out_dtype),
        grid_spec=pltpu.PrefetchScalarGridSpec(
            num_scalar_prefetch=0,
            grid=grid,
            in_specs=[
                pl.BlockSpec((tb, state_dim), lambda i: (i, 0)),    # streamed x tile
                pl.BlockSpec((state_dim, h1p), lambda i: (0, 0)),   # resident W1
                pl.BlockSpec((1, h1p), lambda i: (0, 0)),           # resident b1
                pl.BlockSpec((h1p, feat), lambda i: (0, 0)),        # resident W2
                pl.BlockSpec((1, feat), lambda i: (0, 0)),          # resident b2
            ],
            out_specs=pl.BlockSpec((tb, feat), lambda i: (i, 0)),   # unpadded output
        ),
        compiler_params=pltpu.CompilerParams(
            dimension_semantics=("parallel",),     # batch steps shard across v7x TCs
            vmem_limit_bytes=32 * 1024 * 1024,     # raise vs v5e's 16 MiB default;
                                                   # leaves headroom on v7x (64 MiB)
        ),
    )(x, w1_t, b1_p, w2_t, b2_p)


# ------------------------------------------------------------------------- reference
def reference_forward(x, w1, b1, w2, b2):
    h1 = jnp.maximum(x @ w1.T + b1, 0.0)
    h2 = jnp.maximum(h1 @ w2.T + b2, 0.0)
    return h2


if __name__ == "__main__":
    # Small shapes consistent with the module: FCBody(state_dim=8, hidden_units=(64, 64)).
    state_dim = 8
    hidden_units = (64, 64)

    key = jax.random.PRNGKey(0)
    kx, kw1, kb1, kw2, kb2, kx2 = jax.random.split(key, 6)

    # Synthetic layer_init-style params in nn.Linear layout (out, in).
    w1 = jax.random.normal(kw1, (hidden_units[0], state_dim), dtype=jnp.float32) * 0.1
    b1 = jax.random.normal(kb1, (hidden_units[0],), dtype=jnp.float32) * 0.01
    w2 = jax.random.normal(kw2, (hidden_units[1], hidden_units[0]), dtype=jnp.float32) * 0.1
    b2 = jax.random.normal(kb2, (hidden_units[1],), dtype=jnp.float32) * 0.01

    # One-time packing (transpose + hidden-dim 128-lane pad + bf16 cast).
    params = prepare_fcbody_params(w1, b1, w2, b2, compute_dtype=jnp.bfloat16)

    # --- tiny batch (single grid step, full-extent tile), bf16 output path ---
    batch = 2
    x = jax.random.normal(kx, (batch, state_dim), dtype=jnp.float32)
    y = jax.block_until_ready(fcbody_forward(x, params))
    y_ref = reference_forward(x, w1, b1, w2, b2)
    assert y.shape == (batch, hidden_units[-1])
    assert jnp.allclose(y.astype(jnp.float32), y_ref, atol=3e-2, rtol=3e-2), \
        "mismatch vs JAX reference (batch=2, bf16 out)"

    # --- multi-step grid with a partial final tile, f32 output path ---
    batch2 = 100
    x2 = jax.random.normal(kx2, (batch2, state_dim), dtype=jnp.float32)
    y2 = jax.block_until_ready(
        fcbody_forward(x2, params, block_batch=32, out_dtype=jnp.float32))
    y2_ref = reference_forward(x2, w1, b1, w2, b2)
    assert y2.shape == (batch2, hidden_units[-1])
    assert jnp.allclose(y2, y2_ref, atol=3e-2, rtol=3e-2), \
        "mismatch vs JAX reference (batch=100, f32 out)"

    # TODO(synk): NoisyLinear / reset_noise path (noisy_linear=True) and
    # hidden_units with != 2 layers are not implemented; this kernel covers the
    # default 2-layer nn.Linear + relu forward only.
    print("KERNEL_OK")
</pallas_src>

<mosaic_0001>
module attributes {stable_mosaic.version = 11 : i64} {
  func.func @fcbody_kernel(%arg0: i32, %arg1: memref<2x8xf32, #tpu.memory_space<vmem>>, %arg2: memref<8x128xbf16, #tpu.memory_space<vmem>>, %arg3: memref<1x128xf32, #tpu.memory_space<vmem>>, %arg4: memref<128x64xbf16, #tpu.memory_space<vmem>>, %arg5: memref<1x64xf32, #tpu.memory_space<vmem>>, %arg6: memref<2x64xbf16, #tpu.memory_space<vmem>>) attributes {dimension_semantics = [#tpu.dimension_semantics<parallel>], iteration_bounds = array<i64: 1>, scalar_prefetch = 0 : i64, scratch_operands = 0 : i64, tpu.core_type = #tpu.core_type<tc>, window_params = [{transform_indices = @transform_0, window_bounds = array<i64: 2, 8>}, {pipeline_mode = #tpu.pipeline_mode<synchronous>, transform_indices = @transform_1, window_bounds = array<i64: 8, 128>}, {pipeline_mode = #tpu.pipeline_mode<synchronous>, transform_indices = @transform_2, window_bounds = array<i64: 1, 128>}, {pipeline_mode = #tpu.pipeline_mode<synchronous>, transform_indices = @transform_3, window_bounds = array<i64: 128, 64>}, {pipeline_mode = #tpu.pipeline_mode<synchronous>, transform_indices = @transform_4, window_bounds = array<i64: 1, 64>}, {transform_indices = @transform_5, window_bounds = array<i64: 2, 64>}]} {
    %c0 = arith.constant 0 : index
    %c0_0 = arith.constant 0 : index
    %0 = vector.load %arg1[%c0, %c0_0] : memref<2x8xf32, #tpu.memory_space<vmem>>, vector<2x8xf32>
    %1 = arith.truncf %0 : vector<2x8xf32> to vector<2x8xbf16>
    %c0_1 = arith.constant 0 : index
    %c0_2 = arith.constant 0 : index
    %2 = vector.load %arg2[%c0_1, %c0_2] : memref<8x128xbf16, #tpu.memory_space<vmem>>, vector<8x128xbf16>
    %cst = arith.constant dense<0.000000e+00> : vector<2x128xf32>
    %3 = tpu.matmul %1, %2, %cst {dimension_numbers = #tpu.dot_dimension_numbers<[1], [0], [0], [1], [0, 0, 1, 1], [], []>} : vector<2x8xbf16>, vector<8x128xbf16>, vector<2x128xf32> -> vector<2x128xf32>
    %c0_3 = arith.constant 0 : index
    %c0_4 = arith.constant 0 : index
    %4 = vector.load %arg3[%c0_3, %c0_4] : memref<1x128xf32, #tpu.memory_space<vmem>>, vector<1x128xf32>
    %5 = vector.broadcast %4 : vector<1x128xf32> to vector<2x128xf32>
    %6 = arith.addf %3, %5 : vector<2x128xf32>
    %cst_5 = arith.constant 0.000000e+00 : f32
    %7 = vector.broadcast %cst_5 : f32 to vector<2x128xf32>
    %8 = arith.maximumf %6, %7 : vector<2x128xf32>
    %9 = arith.truncf %8 : vector<2x128xf32> to vector<2x128xbf16>
    %c0_6 = arith.constant 0 : index
    %c0_7 = arith.constant 0 : index
    %10 = vector.load %arg4[%c0_6, %c0_7] : memref<128x64xbf16, #tpu.memory_space<vmem>>, vector<128x64xbf16>
    %cst_8 = arith.constant dense<0.000000e+00> : vector<2x64xf32>
    %11 = tpu.matmul %9, %10, %cst_8 {dimension_numbers = #tpu.dot_dimension_numbers<[1], [0], [0], [1], [0, 0, 1, 1], [], []>} : vector<2x128xbf16>, vector<128x64xbf16>, vector<2x64xf32> -> vector<2x64xf32>
    %c0_9 = arith.constant 0 : index
    %c0_10 = arith.constant 0 : index
    %12 = vector.load %arg5[%c0_9, %c0_10] : memref<1x64xf32, #tpu.memory_space<vmem>>, vector<1x64xf32>
    %13 = vector.broadcast %12 : vector<1x64xf32> to vector<2x64xf32>
    %14 = arith.addf %11, %13 : vector<2x64xf32>
    %cst_11 = arith.constant 0.000000e+00 : f32
    %15 = vector.broadcast %cst_11 : f32 to vector<2x64xf32>
    %16 = arith.maximumf %14, %15 : vector<2x64xf32>
    %17 = arith.truncf %16 : vector<2x64xf32> to vector<2x64xbf16>
    %c0_12 = arith.constant 0 : index
    %c0_13 = arith.constant 0 : index
    %18 = vector.load %arg6[%c0_12, %c0_13] : memref<2x64xbf16, #tpu.memory_space<vmem>>, vector<2x64xbf16>
    tpu.vector_store %arg6[%c0_12, %c0_13], %17 {strides = array<i32>} : memref<2x64xbf16, #tpu.memory_space<vmem>>, vector<2x64xbf16>,
    return
  }
  func.func @transform_0(%arg0: i32) -> (i32, i32) {
    %c0_i32 = arith.constant 0 : i32
    %c0_i32_0 = arith.constant 0 : i32
    return %arg0, %c0_i32 : i32, i32
  }
  func.func @transform_1(%arg0: i32) -> (i32, i32) {
    %c0_i32 = arith.constant 0 : i32
    %c0_i32_0 = arith.constant 0 : i32
    %c0_i32_1 = arith.constant 0 : i32
    return %c0_i32, %c0_i32_0 : i32, i32
  }
  func.func @transform_2(%arg0: i32) -> (i32, i32) {
    %c0_i32 = arith.constant 0 : i32
    %c0_i32_0 = arith.constant 0 : i32
    %c0_i32_1 = arith.constant 0 : i32
    return %c0_i32, %c0_i32_0 : i32, i32
  }
  func.func @transform_3(%arg0: i32) -> (i32, i32) {
    %c0_i32 = arith.constant 0 : i32
    %c0_i32_0 = arith.constant 0 : i32
    %c0_i32_1 = arith.constant 0 : i32
    return %c0_i32, %c0_i32_0 : i32, i32
  }
  func.func @transform_4(%arg0: i32) -> (i32, i32) {
    %c0_i32 = arith.constant 0 : i32
    %c0_i32_0 = arith.constant 0 : i32
    %c0_i32_1 = arith.constant 0 : i32
    return %c0_i32, %c0_i32_0 : i32, i32
  }
  func.func @transform_5(%arg0: i32) -> (i32, i32) {
    %c0_i32 = arith.constant 0 : i32
    %c0_i32_0 = arith.constant 0 : i32
    return %arg0, %c0_i32 : i32, i32
  }
}

</mosaic_0001>

<bundles_post_ra>
// kernel: fcbody_forward.1
= control target key start
LH: loop header
LB: loop body
LE: loop exit
PB: predicated region body
PF: predicated region fallthrough
CT: control target
= control target key end

     0   :  { %vm36_vm0 = vcmask 1043456   ;;  %vm32_vm1 = vcmask 64512   ;;  %v294_v1 = vmov 0.0   ;;  %vm295_vm2 = vmmov 0   ;;  %s375_s0 = inlined_call_operand.vmem [shape: f32[2,8], index: 0, kind: input, shape index: {}]   ;;  %s376_s1 = inlined_call_operand.vmem [shape: bf16[8,128], index: 1, kind: input, shape index: {}]   ;;  %s377_s2 = inlined_call_operand.vmem [shape: f32[1,128], index: 2, kind: input, shape index: {}]   ;;  %s378_s3 = inlined_call_operand.vmem [shape: bf16[128,64], index: 3, kind: input, shape index: {}]   ;;  %s379_s4 = inlined_call_operand.vmem [shape: f32[1,64], index: 4, kind: input, shape index: {}]   ;;  %s380_s5 = inlined_call_operand.hbm [shape: bf16[2,64], index: 5, kind: output, shape index: {}]  }
   0x1   :  { %v24_v0 = vld [vmem:[%s376_s1] sm:$0xf]  ;;  %233 = vmatprep.subr.bf16.mxu0 %v294_v1  ;;  %235 = vmatprep.mubr.msk.bf16.mxu0 %vm295_vm2, %v294_v1  ;;  %v263_v6 = vld [vmem:[%s378_s3 + $0x8] sm:$0xff]   ;;  %v264_v7 = vld [vmem:[%s378_s3 + $0x10] sm:$0xff]  }
   0x2   :  { %v38_v2 = vsel %vm36_vm0, %v24_v0, 0  ;;  %v22_v3 = vld [vmem:[%s375_s0] sm:$0x3]  ;;  %239 = vmatprep.subr.bf16.mxu1 %v294_v1  ;;  %255 = vmatprep.mubr.msk.bf16.mxu1 %vm295_vm2, %v294_v1 }
   0x3   :  { %v262_v4 = vld [vmem:[%s378_s3] sm:$0xff]   ;;  %234 = vmatpush3.bf16.msra.mxu0 %v38_v2  ;;  %v23_v5 = vpack.c.bf16 %v22_v3, %v22_v3 }
   0x4   :  { %240 = vmatpush3.bf16.msra.mxu1 %v262_v4 }
   0x5   :  { %241 = vmatprep.subr.bf16.mxu1 %v294_v1 }
   0x6   :  { %236 = vmatmul.mubr.msk.bf16.vlgmr.msra.gmra.mrb[0].mxu0 %vm32_vm1, %v23_v5 }
   0x8   :  { %242 = vmatpush3.bf16.msra.mxu1 %v263_v6 }
   0x9   :  { %243 = vmatprep.subr.bf16.mxu1 %v294_v1 }
   0xa   :  { %10 = vsyncpa [#allocation3], 0  ;;  %v265_v8 = vld [vmem:[%s378_s3 + $0x18] sm:$0xff]   ;;  %v266_v9 = vld [vmem:[%s378_s3 + $0x20] sm:$0xff]   ;;  %vm195_vm3 = vcmask 516096  }
   0xb   :  { %v267_v10 = vld [vmem:[%s378_s3 + $0x28] sm:$0xff]   ;;  %v268_v11 = vld [vmem:[%s378_s3 + $0x30] sm:$0xff]   ;;  %v269_v12 = vld [vmem:[%s378_s3 + $0x38] sm:$0xff]   ;;  %s296_s3 = smov [#allocation2]  }
   0xc   :  { %244 = vmatpush3.bf16.msra.mxu1 %v264_v7  ;;  %v211_v13 = vld [vmem:[%s377_s2] ss:$0 sm:$0xff]  ;;  %s203_s15 = sshll.u32 %s296_s3, 4  ;;  %s204_s15 = int_to_ptr.vmem [resolvable:$true] %s203_s15 }
   0xd   :  { %245 = vmatprep.subr.bf16.mxu1 %v294_v1  ;;  %v213_v21 = vld [vmem:[%s379_s4] ss:$0 sm:$0xff]  ;;  %s270_s2 = scalar_lea.vmem %s204_s15, 16  ;;  %s274_s16 = scalar_lea.vmem %s204_s15, 32 }
   0xe   :  { %p271_p0 = scmp.ne.s32.totalorder %s204_s15, %s270_s2  ;;  %p275_p1 = scmp.lt.s32.totalorder %s204_s15, %s204_s15 }
   0xf   :  { %p276_p2 = scmp.lt.s32.totalorder %s274_s16, %s270_s2 }
  0x10   :  { %246 = vmatpush3.bf16.msra.mxu1 %v265_v8 }
  0x11   :  { %247 = vmatprep.subr.bf16.mxu1 %v294_v1  ;;  %p277_p3 = por %p276_p2, %p275_p1 }
  0x13   :  { %p278_p4 = pnand %p277_p3, %p271_p0 }
  0x14   :  { %248 = vmatpush3.bf16.msra.mxu1 %v266_v9 }
  0x15   :  { %249 = vmatprep.subr.bf16.mxu1 %v294_v1 }
  0x18   :  { %250 = vmatpush3.bf16.msra.mxu1 %v267_v10 }
  0x19   :  { %251 = vmatprep.subr.bf16.mxu1 %v294_v1 }
  0x1c   :  { %252 = vmatpush3.bf16.msra.mxu1 %v268_v11 }
  0x1d   :  { %253 = vmatprep.subr.bf16.mxu1 %v294_v1 }
  0x20   :  { %254 = vmatpush3.bf16.msra.mxu1 %v269_v12 }
  0xd9   :  { %v74_v14 = vpop.f32.mrb[0].mxu0 }
  0xda   :  { %v75_v15 = vadd.f32 %v211_v13, %v74_v14  ;;  %v237_v16 = vpop.f32.mrb[1].mxu0 }
  0xdb   :  { %v77_v17 = vpop.f32.mrb[2].mxu0 }
  0xdc   :  { %v80_v18 = vmax.f32 %v75_v15, 0.0  ;;  %v238_v19 = vpop.f32.mrb[3].mxu0 }
  0xde   :  { %v81_v20 = vpack.c.bf16 %v80_v18, %v80_v18 }
  0xe0   :  { %256 = vmatmul.mubr.bf16.vlgmr.msra.gmra.mrb[0].mxu1 %v81_v20 }
 0x1b3   :  { %v187_v22 = vpop.f32.mrb[0].mxu1 }
 0x1b4   :  { %v188_v23 = vadd.f32 %v213_v21, %v187_v22  ;;  %v257_v24 = vpop.f32.mrb[1].mxu1 }
 0x1b5   :  { %v190_v25 = vpop.f32.mrb[2].mxu1 }
 0x1b6   :  { %v193_v26 = vmax.f32 %v188_v23, 0.0  ;;  %v258_v27 = vpop.f32.mrb[3].mxu1 }
 0x1b8   :  { %v194_v28 = vpack.c.bf16 %v193_v26, %v193_v26 }
 0x1ba   :  { %196 = vst.msk [vmem:[#allocation2] sm:$0x1] %vm195_vm3, %v194_v28 }
 0x1bb   :  { %281 = shalt.err (!%p278_p4)
}
 0x1bc   :  { %s282_s18 = scalar_lea.hbm %s380_s5, 16 }
 0x1bd   :  { %p283_p5 = scmp.ne.s32.totalorder %s380_s5, %s282_s18  ;;  %p286_p6 = scmp.lt.u32.totalorder %s282_s18, %s380_s5 }
 0x1bf   :  { %p288_p7 = pnand %p286_p6, %p283_p5 }
 0x1c1   :  { %291 = shalt.err (!%p288_p7)
}
 0x1c2   :  { %206 = dma.vmem_to_hbm [thread:$0]  %s204_s15, 16, %s380_s5, [#allocation3]  }
 0x1c3   :  { %292 = dma.done.wait [#allocation3], 16  }
 0x1c4   :  { %293 = vsyncadd [#allocation3], 4294967280 }
 0x1c5   :  { %210 = vsyncpa [#allocation3], 1 }

</bundles_post_ra>
